<compile_context>
chip_gen: v6e
topology: v6e:2x2x1
jax: 0.10.0
libtpu: 0.0.40
codegen_flags: <defaults>
</compile_context>

<pallas_src>
import numpy as np
import jax
import jax.numpy as jnp
from jax.experimental import pallas as pl
from jax.experimental.pallas import tpu as pltpu

NUM_CLASSES = 4


# ---------------------------------------------------------------------------
# Bilinear ConvTranspose2d init (get_upsampling_weight) expressed as a 1-D
# upsampling matrix U so that conv_transpose2d(x, W_bilinear) == U_h @ x @ U_w^T
# (the bilinear weight is diagonal in channels and separable).
# ---------------------------------------------------------------------------
def _bilinear_1d(kernel_size):
    factor = (kernel_size + 1) // 2
    if kernel_size % 2 == 1:
        center = factor - 1
    else:
        center = factor - 0.5
    og = np.arange(kernel_size)
    return 1.0 - np.abs(og - center) / factor


def upsample_matrix(in_len, kernel_size, stride, padding):
    """U[o, i] = filt_1d[o + padding - i*stride]  (1-D transposed conv). numpy f32."""
    out_len = (in_len - 1) * stride - 2 * padding + kernel_size
    f = _bilinear_1d(kernel_size)
    U = np.zeros((out_len, in_len), dtype=np.float32)
    for o in range(out_len):
        for i in range(in_len):
            k = o + padding - i * stride
            if 0 <= k < kernel_size:
                U[o, i] = f[k]
    return U


# ---------------------------------------------------------------------------
# FCN8s head parameters (the three 1x1 score convs; upsamplers are fixed
# bilinear, exactly as in the PyTorch module's _init_weight).
# ---------------------------------------------------------------------------
def init_fcn8s_params(key, num_classes):
    k = jax.random.split(key, 6)

    def conv1x1(kw, kb, cin):
        bound = 1.0 / np.sqrt(cin)  # PyTorch Conv2d default init bounds
        w = jax.random.uniform(kw, (cin, num_classes), jnp.float32, -bound, bound)
        b = jax.random.uniform(kb, (num_classes,), jnp.float32, -bound, bound)
        return w, b

    w3, b3 = conv1x1(k[0], k[1], 128)
    w4, b4 = conv1x1(k[2], k[3], 256)
    w5, b5 = conv1x1(k[4], k[5], 512)
    return dict(w3=w3, b3=b3, w4=w4, b4=b4, w5=w5, b5=b5)


def _pick_row_splits(total_out_rows):
    """2-way output-row split only where a second TensorCore exists."""
    try:
        kind = jax.devices()[0].device_kind.lower()
    except Exception:
        return 1
    multi_tc = any(tag in kind for tag in ("v4", "v5p", "v7", "7x"))
    if multi_tc and total_out_rows % 16 == 0:
        return 2
    return 1


# ---------------------------------------------------------------------------
# One-time constant prep (pure numpy -> jnp constants).  Layout everywhere is
# "rows = (n, h), lanes = channel-blocked width": a (C, H, W) map is (H, C*W).
# ---------------------------------------------------------------------------
def prepare_fcn8s_head(params, num_classes, x3_shape, x4_shape, x5_shape,
                       compute_dtype=jnp.bfloat16):
    nc = num_classes
    N, H3, W3, C3 = x3_shape
    N4, H4, W4, C4 = x4_shape
    N5, H5, W5, C5 = x5_shape
    assert N == N4 == N5
    # Standard /8,/16,/32 pyramid required for the residual adds (scope
    # restriction of this implementation, matching clean FCN8s inputs).
    assert H3 == 2 * H4 and H3 == 4 * H5, (H3, H4, H5)
    assert W3 == 2 * W4 and W3 == 4 * W5, (W3, W4, W5)
    K = W3 * C3
    assert K == W4 * C4 == W5 * C5, (W3 * C3, W4 * C4, W5 * C5)
    OH, OW = 8 * H3, 8 * W3
    NH3, NH4, NH5 = N * H3, N * H4, N * H5
    ncW3, ncW4, ncW5 = nc * W3, nc * W4, nc * W5

    w3 = np.asarray(params["w3"], np.float32); b3 = np.asarray(params["b3"], np.float32)
    w4 = np.asarray(params["w4"], np.float32); b4 = np.asarray(params["b4"], np.float32)
    w5 = np.asarray(params["w5"], np.float32); b5 = np.asarray(params["b5"], np.float32)

    def blk_score_w(w, wdim):
        # (Cin, nc) -> (wdim*Cin, nc*wdim); Wblk[w*Cin+k, c*wdim+w'] = d(w,w') W[k,c]
        cin = w.shape[0]
        t = np.zeros((wdim, cin, nc, wdim), np.float32)
        idx = np.arange(wdim)
        t[idx, :, :, idx] = w[None, :, :]
        return t.reshape(wdim * cin, nc * wdim)

    # Column-concatenated blocked score weight: (K, nc*(W3+W4+W5))
    wcat = np.concatenate(
        [blk_score_w(w3, W3), blk_score_w(w4, W4), blk_score_w(w5, W5)], axis=1)

    # Mask / bias matrices applied to the fused score matmul result.
    NHtot = NH3 + NH4 + NH5
    ncWtot = ncW3 + ncW4 + ncW5
    mask = np.zeros((NHtot, ncWtot), np.float32)
    bias = np.zeros((NHtot, ncWtot), np.float32)
    mask[:NH3, :ncW3] = 1.0
    mask[NH3:NH3 + NH4, ncW3:ncW3 + ncW4] = 1.0
    mask[NH3 + NH4:, ncW3 + ncW4:] = 1.0
    bias[:NH3, :ncW3] = np.repeat(b3, W3)[None, :]
    bias[NH3:NH3 + NH4, ncW3:ncW3 + ncW4] = np.repeat(b4, W4)[None, :]
    bias[NH3 + NH4:, ncW3 + ncW4:] = np.repeat(b5, W5)[None, :]

    def blk_uwt(uw):
        # uw: (Wout, Win) -> per-class block-diag transposed: (nc*Win, nc*Wout)
        wout, win = uw.shape
        t = np.zeros((nc, win, nc, wout), np.float32)
        idx = np.arange(nc)
        t[idx, :, idx, :] = uw.T[None, :, :]
        return t.reshape(nc * win, nc * wout)

    eyeN = np.eye(N, dtype=np.float32)
    u4h = upsample_matrix(H4, 4, 2, 1)                      # (H3, H4)
    u5h = upsample_matrix(H5, 8, 4, 2)                      # (H3, H5)
    uh = upsample_matrix(H3, 16, 8, 4)                      # (OH, H3)
    # Batch-folded (block-diag over samples) row-upsampling matrices.
    u45h = np.concatenate([np.kron(eyeN, u4h), np.kron(eyeN, u5h)], axis=1)  # (NH3, NH4+NH5)
    uh_fold = np.kron(eyeN, uh)                                              # (N*OH, NH3)
    # Stacked per-class block-diag width-upsampling matrices.
    u45wt = np.concatenate([blk_uwt(upsample_matrix(W4, 4, 2, 1)),
                            blk_uwt(upsample_matrix(W5, 8, 4, 2))], axis=0)  # (ncW4+ncW5, ncW3)
    uwt = blk_uwt(upsample_matrix(W3, 16, 8, 4))                             # (ncW3, nc*OW)

    cd = compute_dtype
    return dict(
        num_classes=nc, N=N, H3=H3, W3=W3, H4=H4, W4=W4, H5=H5, W5=W5,
        OH=OH, OW=OW, K=K,
        row_splits=_pick_row_splits(N * OH),
        compute_dtype=cd,
        wcat=jnp.asarray(wcat, cd),
        mask=jnp.asarray(mask, jnp.float32),
        bias=jnp.asarray(bias, jnp.float32),
        u45h=jnp.asarray(u45h, cd),
        u45wt=jnp.asarray(u45wt, cd),
        uh_fold=jnp.asarray(uh_fold, cd),
        uwt=jnp.asarray(uwt, cd),
    )


# ---------------------------------------------------------------------------
# Fused head kernel: 5 small matmuls, everything resident in VMEM.
# ---------------------------------------------------------------------------
def _make_head_kernel(NH3, NH4, NH5, ncW3, ncW4, ncW5, compute_dtype):
    f32 = jnp.float32

    def kernel(x_ref, w_ref, mask_ref, bias_ref, u45h_ref, u45wt_ref,
               uh_ref, uwt_ref, o_ref):
        # Fused score3/4/5: one matmul over the shared K, then mask the
        # cross-scale garbage blocks and add the per-channel biases.
        s = jnp.dot(x_ref[...], w_ref[...], preferred_element_type=f32)
        s = s * mask_ref[...] + bias_ref[...]
        s3 = s[:NH3, :ncW3]                                        # (NH3, ncW3)
        # [[s4+b4, 0], [0, s5+b5]] falls straight out of the masked matrix.
        bd = s[NH3:NH3 + NH4 + NH5,
               ncW3:ncW3 + ncW4 + ncW5].astype(compute_dtype)      # (NH4+NH5, ncW4+ncW5)
        # upscore4 + upscore5 + add, fused into two matmuls.
        u45 = jnp.dot(
            jnp.dot(u45h_ref[...], bd, preferred_element_type=f32).astype(compute_dtype),
            u45wt_ref[...], preferred_element_type=f32)            # (NH3, ncW3)
        fused = (s3 + u45).astype(compute_dtype)
        # Final upscore (k=16, s=8, p=4): row-upsample then width-upsample.
        rows = jnp.dot(uh_ref[...], fused,
                       preferred_element_type=f32).astype(compute_dtype)
        o_ref[...] = jnp.dot(rows, uwt_ref[...],
                             preferred_element_type=f32).astype(o_ref.dtype)

    return kernel


# ---------------------------------------------------------------------------
# Forward: NHWC feature maps -> NCHW output (N, num_classes, 8*H3, 8*W3).
# ---------------------------------------------------------------------------
def fcn8s_forward(prep, x3, x4, x5):
    nc = prep["num_classes"]
    N, H3, W3 = prep["N"], prep["H3"], prep["W3"]
    H4, W4, H5, W5 = prep["H4"], prep["W4"], prep["H5"], prep["W5"]
    OH, OW, K = prep["OH"], prep["OW"], prep["K"]
    cd = prep["compute_dtype"]

    assert x3.shape[:3] == (N, H3, W3) and x3.shape[3] * W3 == K, x3.shape
    assert x4.shape[:3] == (N, H4, W4) and x4.shape[3] * W4 == K, x4.shape
    assert x5.shape[:3] == (N, H5, W5) and x5.shape[3] * W5 == K, x5.shape

    NH3, NH4, NH5 = N * H3, N * H4, N * H5
    ncW3, ncW4, ncW5 = nc * W3, nc * W4, nc * W5

    # NHWC -> (N*H, W*C) contiguous reshapes; one fused row concat (shared K).
    X = jnp.concatenate(
        [x3.reshape(NH3, W3 * x3.shape[3]),
         x4.reshape(NH4, W4 * x4.shape[3]),
         x5.reshape(NH5, W5 * x5.shape[3])], axis=0).astype(cd)

    rs = prep["row_splits"]
    full = lambda i: (0, 0)
    rowb = lambda i: (i, 0)

    operands = (X, prep["wcat"], prep["mask"], prep["bias"],
                prep["u45h"], prep["u45wt"], prep["uh_fold"], prep["uwt"])

    flops = 2 * (X.shape[0] * K * prep["wcat"].shape[1]
                 + NH3 * (NH4 + NH5) * (ncW4 + ncW5)
                 + NH3 * (ncW4 + ncW5) * ncW3
                 + N * OH * NH3 * ncW3
                 + N * OH * ncW3 * nc * OW)
    bytes_accessed = (sum(int(np.prod(a.shape)) * a.dtype.itemsize for a in operands)
                      + N * OH * nc * OW * 4)

    out_l = pl.pallas_call(
        _make_head_kernel(NH3, NH4, NH5, ncW3, ncW4, ncW5, cd),
        out_shape=jax.ShapeDtypeStruct((N * OH, nc * OW), jnp.float32),
        grid=(rs,),
        in_specs=[
            pl.BlockSpec(tuple(X.shape), full),
            pl.BlockSpec(tuple(prep["wcat"].shape), full),
            pl.BlockSpec(tuple(prep["mask"].shape), full),
            pl.BlockSpec(tuple(prep["bias"].shape), full),
            pl.BlockSpec(tuple(prep["u45h"].shape), full),
            pl.BlockSpec(tuple(prep["u45wt"].shape), full),
            pl.BlockSpec((N * OH // rs, NH3), rowb),       # row-split on multi-TC chips
            pl.BlockSpec(tuple(prep["uwt"].shape), full),
        ],
        out_specs=pl.BlockSpec((N * OH // rs, nc * OW), rowb),
        compiler_params=pltpu.CompilerParams(
            dimension_semantics=("parallel",)),
        cost_estimate=pl.CostEstimate(flops=flops, transcendentals=0,
                                      bytes_accessed=bytes_accessed),
    )(*operands)

    # (N*OH, nc*OW) lane-dense -> NCHW to keep the PyTorch output contract.
    # (Skip this transpose if the consumer accepts the lane-dense layout.)
    return out_l.reshape(N, OH, nc, OW).transpose(0, 2, 1, 3)


# ---------------------------------------------------------------------------
# Pure-JAX f32 reference of the head (same math as the PyTorch module).
# ---------------------------------------------------------------------------
def fcn8s_reference(params, x3, x4, x5, num_classes):
    f32 = jnp.float32

    def score(x, w, b):
        return jnp.einsum("nhwc,ck->nhwk", x.astype(f32), w.astype(f32)) + b.astype(f32)

    def up(x, k, s, p):
        _, H, W, _ = x.shape
        Uh = jnp.asarray(upsample_matrix(H, k, s, p))
        Uw = jnp.asarray(upsample_matrix(W, k, s, p))
        return jnp.einsum("oh,nhwc,pw->nopc", Uh, x, Uw)

    s3 = score(x3, params["w3"], params["b3"])
    s4 = score(x4, params["w4"], params["b4"])
    s5 = score(x5, params["w5"], params["b5"])
    fused = s3 + up(s4, 4, 2, 1) + up(s5, 8, 4, 2)
    out = up(fused, 16, 8, 4)
    return jnp.transpose(out, (0, 3, 1, 2))


# ---------------------------------------------------------------------------
# Synthetic encoder stand-in (the `encorder` argument is an external,
# unspecified module); produces the /8, /16, /32 bf16 feature maps with
# 128/256/512 channels.
# ---------------------------------------------------------------------------
# TODO(synk): the real encoder backbone is external to FCN8s and not specified.
def make_encoder(key):
    k3, k4, k5 = jax.random.split(key, 3)
    enc_w3 = jax.random.normal(k3, (3, 128), jnp.float32) * 0.1
    enc_w4 = jax.random.normal(k4, (3, 256), jnp.float32) * 0.1
    enc_w5 = jax.random.normal(k5, (3, 512), jnp.float32) * 0.1

    def encoder(x_nhwc):
        def stage(f, w):
            N, H, W, C = x_nhwc.shape
            xp = x_nhwc.reshape(N, H // f, f, W // f, f, C).mean(axis=(2, 4))
            return jnp.einsum("nhwc,cd->nhwd", xp, w).astype(jnp.bfloat16)

        return stage(8, enc_w3), stage(16, enc_w4), stage(32, enc_w5)

    return encoder


if __name__ == "__main__":
    key = jax.random.PRNGKey(0)
    kx, kp, ke = jax.random.split(key, 3)

    N, C_in, H, W = 2, 3, 64, 64
    x = jax.random.normal(kx, (N, C_in, H, W), jnp.float32)  # NCHW input

    params = init_fcn8s_params(kp, NUM_CLASSES)
    encoder = make_encoder(ke)

    x_nhwc = jnp.transpose(x, (0, 2, 3, 1))
    x3, x4, x5 = encoder(x_nhwc)      # (2,8,8,128), (2,4,4,256), (2,2,2,512) bf16

    prep = prepare_fcn8s_head(params, NUM_CLASSES, x3.shape, x4.shape, x5.shape)
    fwd = jax.jit(lambda a, b, c: fcn8s_forward(prep, a, b, c))

    out = jax.block_until_ready(fwd(x3, x4, x5))
    assert out.shape == (N, NUM_CLASSES, H, W), out.shape

    ref = jax.block_until_ready(fcn8s_reference(params, x3, x4, x5, NUM_CLASSES))
    err = float(jnp.max(jnp.abs(out - ref)))
    scale = float(jnp.max(jnp.abs(ref))) + 1e-6
    assert err <= 3e-2 * scale, (err, scale)

    print("KERNEL_OK")
</pallas_src>

<mosaic_0001>
module attributes {stable_mosaic.version = 11 : i64} {
  func.func @kernel(%arg0: i32, %arg1: memref<28x1024xbf16, #tpu.memory_space<vmem>>, %arg2: memref<1024x56xbf16, #tpu.memory_space<vmem>>, %arg3: memref<28x56xf32, #tpu.memory_space<vmem>>, %arg4: memref<28x56xf32, #tpu.memory_space<vmem>>, %arg5: memref<16x12xbf16, #tpu.memory_space<vmem>>, %arg6: memref<24x32xbf16, #tpu.memory_space<vmem>>, %arg7: memref<128x16xbf16, #tpu.memory_space<vmem>>, %arg8: memref<32x256xbf16, #tpu.memory_space<vmem>>, %arg9: memref<128x256xf32, #tpu.memory_space<vmem>>) attributes {dimension_semantics = [#tpu.dimension_semantics<parallel>], iteration_bounds = array<i64: 1>, scalar_prefetch = 0 : i64, scratch_operands = 0 : i64, tpu.core_type = #tpu.core_type<tc>, window_params = [{pipeline_mode = #tpu.pipeline_mode<synchronous>, transform_indices = @transform_0, window_bounds = array<i64: 28, 1024>}, {pipeline_mode = #tpu.pipeline_mode<synchronous>, transform_indices = @transform_1, window_bounds = array<i64: 1024, 56>}, {pipeline_mode = #tpu.pipeline_mode<synchronous>, transform_indices = @transform_2, window_bounds = array<i64: 28, 56>}, {pipeline_mode = #tpu.pipeline_mode<synchronous>, transform_indices = @transform_3, window_bounds = array<i64: 28, 56>}, {pipeline_mode = #tpu.pipeline_mode<synchronous>, transform_indices = @transform_4, window_bounds = array<i64: 16, 12>}, {pipeline_mode = #tpu.pipeline_mode<synchronous>, transform_indices = @transform_5, window_bounds = array<i64: 24, 32>}, {transform_indices = @transform_6, window_bounds = array<i64: 128, 16>}, {pipeline_mode = #tpu.pipeline_mode<synchronous>, transform_indices = @transform_7, window_bounds = array<i64: 32, 256>}, {transform_indices = @transform_8, window_bounds = array<i64: 128, 256>}]} {
    %c0 = arith.constant 0 : index
    %c0_0 = arith.constant 0 : index
    %0 = vector.load %arg1[%c0, %c0_0] : memref<28x1024xbf16, #tpu.memory_space<vmem>>, vector<28x1024xbf16>
    %c0_1 = arith.constant 0 : index
    %c0_2 = arith.constant 0 : index
    %1 = vector.load %arg2[%c0_1, %c0_2] : memref<1024x56xbf16, #tpu.memory_space<vmem>>, vector<1024x56xbf16>
    %cst = arith.constant dense<0.000000e+00> : vector<28x56xf32>
    %2 = tpu.matmul %0, %1, %cst {dimension_numbers = #tpu.dot_dimension_numbers<[1], [0], [0], [1], [0, 0, 1, 1], [], []>} : vector<28x1024xbf16>, vector<1024x56xbf16>, vector<28x56xf32> -> vector<28x56xf32>
    %c0_3 = arith.constant 0 : index
    %c0_4 = arith.constant 0 : index
    %3 = vector.load %arg3[%c0_3, %c0_4] : memref<28x56xf32, #tpu.memory_space<vmem>>, vector<28x56xf32>
    %4 = arith.mulf %2, %3 : vector<28x56xf32>
    %c0_5 = arith.constant 0 : index
    %c0_6 = arith.constant 0 : index
    %5 = vector.load %arg4[%c0_5, %c0_6] : memref<28x56xf32, #tpu.memory_space<vmem>>, vector<28x56xf32>
    %6 = arith.addf %4, %5 : vector<28x56xf32>
    %7 = vector.extract_strided_slice %6 {offsets = [0, 0], sizes = [16, 32], strides = [1, 1]} : vector<28x56xf32> to vector<16x32xf32>
    %8 = vector.extract_strided_slice %6 {offsets = [16, 32], sizes = [12, 24], strides = [1, 1]} : vector<28x56xf32> to vector<12x24xf32>
    %9 = arith.truncf %8 : vector<12x24xf32> to vector<12x24xbf16>
    %c0_7 = arith.constant 0 : index
    %c0_8 = arith.constant 0 : index
    %10 = vector.load %arg5[%c0_7, %c0_8] : memref<16x12xbf16, #tpu.memory_space<vmem>>, vector<16x12xbf16>
    %cst_9 = arith.constant dense<0.000000e+00> : vector<16x24xf32>
    %11 = tpu.matmul %10, %9, %cst_9 {dimension_numbers = #tpu.dot_dimension_numbers<[1], [0], [0], [1], [0, 0, 1, 1], [], []>} : vector<16x12xbf16>, vector<12x24xbf16>, vector<16x24xf32> -> vector<16x24xf32>
    %12 = arith.truncf %11 : vector<16x24xf32> to vector<16x24xbf16>
    %c0_10 = arith.constant 0 : index
    %c0_11 = arith.constant 0 : index
    %13 = vector.load %arg6[%c0_10, %c0_11] : memref<24x32xbf16, #tpu.memory_space<vmem>>, vector<24x32xbf16>
    %cst_12 = arith.constant dense<0.000000e+00> : vector<16x32xf32>
    %14 = tpu.matmul %12, %13, %cst_12 {dimension_numbers = #tpu.dot_dimension_numbers<[1], [0], [0], [1], [0, 0, 1, 1], [], []>} : vector<16x24xbf16>, vector<24x32xbf16>, vector<16x32xf32> -> vector<16x32xf32>
    %15 = arith.addf %7, %14 : vector<16x32xf32>
    %16 = arith.truncf %15 : vector<16x32xf32> to vector<16x32xbf16>
    %c0_13 = arith.constant 0 : index
    %c0_14 = arith.constant 0 : index
    %17 = vector.load %arg7[%c0_13, %c0_14] : memref<128x16xbf16, #tpu.memory_space<vmem>>, vector<128x16xbf16>
    %cst_15 = arith.constant dense<0.000000e+00> : vector<128x32xf32>
    %18 = tpu.matmul %17, %16, %cst_15 {dimension_numbers = #tpu.dot_dimension_numbers<[1], [0], [0], [1], [0, 0, 1, 1], [], []>} : vector<128x16xbf16>, vector<16x32xbf16>, vector<128x32xf32> -> vector<128x32xf32>
    %19 = arith.truncf %18 : vector<128x32xf32> to vector<128x32xbf16>
    %c0_16 = arith.constant 0 : index
    %c0_17 = arith.constant 0 : index
    %20 = vector.load %arg8[%c0_16, %c0_17] : memref<32x256xbf16, #tpu.memory_space<vmem>>, vector<32x256xbf16>
    %cst_18 = arith.constant dense<0.000000e+00> : vector<128x256xf32>
    %21 = tpu.matmul %19, %20, %cst_18 {dimension_numbers = #tpu.dot_dimension_numbers<[1], [0], [0], [1], [0, 0, 1, 1], [], []>} : vector<128x32xbf16>, vector<32x256xbf16>, vector<128x256xf32> -> vector<128x256xf32>
    %c0_19 = arith.constant 0 : index
    %c0_20 = arith.constant 0 : index
    %22 = vector.load %arg9[%c0_19, %c0_20] : memref<128x256xf32, #tpu.memory_space<vmem>>, vector<128x256xf32>
    tpu.vector_store %arg9[%c0_19, %c0_20], %21 {strides = array<i32>} : memref<128x256xf32, #tpu.memory_space<vmem>>, vector<128x256xf32>,
    return
  }
  func.func @transform_0(%arg0: i32) -> (i32, i32) {
    %c0_i32 = arith.constant 0 : i32
    %c0_i32_0 = arith.constant 0 : i32
    %c0_i32_1 = arith.constant 0 : i32
    return %c0_i32, %c0_i32_0 : i32, i32
  }
  func.func @transform_1(%arg0: i32) -> (i32, i32) {
    %c0_i32 = arith.constant 0 : i32
    %c0_i32_0 = arith.constant 0 : i32
    %c0_i32_1 = arith.constant 0 : i32
    return %c0_i32, %c0_i32_0 : i32, i32
  }
  func.func @transform_2(%arg0: i32) -> (i32, i32) {
    %c0_i32 = arith.constant 0 : i32
    %c0_i32_0 = arith.constant 0 : i32
    %c0_i32_1 = arith.constant 0 : i32
    return %c0_i32, %c0_i32_0 : i32, i32
  }
  func.func @transform_3(%arg0: i32) -> (i32, i32) {
    %c0_i32 = arith.constant 0 : i32
    %c0_i32_0 = arith.constant 0 : i32
    %c0_i32_1 = arith.constant 0 : i32
    return %c0_i32, %c0_i32_0 : i32, i32
  }
  func.func @transform_4(%arg0: i32) -> (i32, i32) {
    %c0_i32 = arith.constant 0 : i32
    %c0_i32_0 = arith.constant 0 : i32
    %c0_i32_1 = arith.constant 0 : i32
    return %c0_i32, %c0_i32_0 : i32, i32
  }
  func.func @transform_5(%arg0: i32) -> (i32, i32) {
    %c0_i32 = arith.constant 0 : i32
    %c0_i32_0 = arith.constant 0 : i32
    %c0_i32_1 = arith.constant 0 : i32
    return %c0_i32, %c0_i32_0 : i32, i32
  }
  func.func @transform_6(%arg0: i32) -> (i32, i32) {
    %c0_i32 = arith.constant 0 : i32
    %c0_i32_0 = arith.constant 0 : i32
    return %arg0, %c0_i32 : i32, i32
  }
  func.func @transform_7(%arg0: i32) -> (i32, i32) {
    %c0_i32 = arith.constant 0 : i32
    %c0_i32_0 = arith.constant 0 : i32
    %c0_i32_1 = arith.constant 0 : i32
    return %c0_i32, %c0_i32_0 : i32, i32
  }
  func.func @transform_8(%arg0: i32) -> (i32, i32) {
    %c0_i32 = arith.constant 0 : i32
    %c0_i32_0 = arith.constant 0 : i32
    return %arg0, %c0_i32 : i32, i32
  }
}

</mosaic_0001>

<bundles_post_ra>
// kernel: _lambda_.1
= control target key start
LH: loop header
LB: loop body
LE: loop exit
PB: predicated region body
PF: predicated region fallthrough
CT: control target
= control target key end

     0   :  { %13 = vsyncpa [#allocation3], 0  ;;  %s1759_s27 = smov [#allocation2]   ;;  %s2046_s0 = inlined_call_operand.vmem [shape: bf16[28,1024], index: 0, kind: input, shape index: {}]   ;;  %s2047_s1 = inlined_call_operand.hbm [shape: bf16[1024,56], index: 1, kind: input, shape index: {}]   ;;  %s2048_s2 = inlined_call_operand.vmem [shape: f32[28,56], index: 2, kind: input, shape index: {}]   ;;  %s2049_s3 = inlined_call_operand.vmem [shape: f32[28,56], index: 3, kind: input, shape index: {}]   ;;  %s2050_s4 = inlined_call_operand.vmem [shape: bf16[16,12], index: 4, kind: input, shape index: {}]   ;;  %s2051_s5 = inlined_call_operand.vmem [shape: bf16[24,32], index: 5, kind: input, shape index: {}]   ;;  %s2052_s6 = inlined_call_operand.vmem [shape: bf16[128,16], index: 6, kind: input, shape index: {}]   ;;  %s2053_s7 = inlined_call_operand.vmem [shape: bf16[32,256], index: 7, kind: input, shape index: {}]   ;;  %s2054_s8 = inlined_call_operand.vmem [shape: f32[128,256], index: 8, kind: output, shape index: {}]  }
   0x1   :  { %s21_s28 = sshll.u32 %s1759_s27, 4  ;;  %s22_s28 = int_to_ptr.vmem [resolvable:$true] %s21_s28 }
   0x2   :  { %s1745_s29 = scalar_lea.vmem %s22_s28, 8192  ;;  %p1750_p1 = scmp.lt.s32.totalorder %s22_s28, %s22_s28 }
   0x3   :  { %p1746_p0 = scmp.ne.s32.totalorder %s22_s28, %s1745_s29  ;;  %p1751_p2 = scmp.lt.s32.totalorder %s1745_s29, %s1745_s29 }
   0x5   :  { %p1752_p3 = por %p1751_p2, %p1750_p1 }
   0x7   :  { %p1753_p4 = pnand %p1752_p3, %p1746_p0 }
   0x9   :  { %1756 = shalt.err (!%p1753_p4)
}
   0xa   :  { %s1760_s30 = smov 64   ;;  %s1761_s9 = smov 4  }
   0xb   :  { %27 = dma.hbm_to_vmem [thread:$0]  %s2047_s1, 8192, %s22_s28, [#allocation3], %s1760_s30, %s1760_s30, %s1761_s9  }
   0xc   :  { %1757 = dma.done.wait [#allocation3], 8192  }
   0xd   :  { %1758 = vsyncadd [#allocation3], 4294959104  ;;  %v1656_v0 = vld [vmem:[#allocation2 + $0x78] sm:$0xff]   ;;  %v1660_v4 = vld [vmem:[#allocation2 + $0x70] sm:$0xff]   ;;  %vm1763_vm0 = vmmov 0   ;;  %s1764_s27 = smov 96  }
   0xe   :  { %v1657_v1 = vld [vmem:[#allocation2 + $0xf8] sm:$0xff]   ;;  %1487 = vmatprep.subr.bf16.mxu0 %v1656_v0  ;;  %v1661_v5 = vld [vmem:[#allocation2 + $0xf0] sm:$0xff]   ;;  %v1664_v8 = vld [vmem:[#allocation2 + $0x68] sm:$0xff]   ;;  %vm879_vm1 = vcmask 1045504   ;;  %vm875_vm2 = vcmask 97280   ;;  %vm941_vm3 = vcmask 1043456  }
   0xf   :  { %v1658_v2 = vld [vmem:[#allocation2 + $0x38] sm:$0xff]   ;;  %1515 = vmatprep.subr.bf16.mxu1 %v1657_v1  ;;  %v1662_v6 = vld [vmem:[#allocation2 + $0x30] sm:$0xff]   ;;  %v1665_v9 = vld [vmem:[#allocation2 + $0xe8] sm:$0xff]   ;;  %vm937_vm4 = vcmask 195584   ;;  %vm1045_vm5 = vcmask 130048   ;;  %vm1199_vm6 = vcmask 261120  }
  0x10   :  { %v1659_v3 = vld [vmem:[#allocation2 + $0xb8] sm:$0xff]   ;;  %1488 = vmatpush3.bf16.msra.mxu0 %v1658_v2  ;;  %v1663_v7 = vld [vmem:[#allocation2 + $0xb0] sm:$0xff]   ;;  %v1666_v10 = vld [vmem:[#allocation2 + $0x28] sm:$0xff]  }
  0x11   :  { %1516 = vmatpush3.bf16.msra.mxu1 %v1659_v3  ;;  %1489 = vmatprep.subr.bf16.mxu0 %v1660_v4  ;;  %v1667_v11 = vld [vmem:[#allocation2 + $0xa8] sm:$0xff]   ;;  %v1668_v12 = vld [vmem:[#allocation2 + $0x60] sm:$0xff]   ;;  %v1672_v16 = vld [vmem:[#allocation2 + $0x58] sm:$0xff]  }
  0x12   :  { %1517 = vmatprep.subr.bf16.mxu1 %v1661_v5  ;;  %v1669_v13 = vld [vmem:[#allocation2 + $0xe0] sm:$0xff]   ;;  %v1673_v17 = vld [vmem:[#allocation2 + $0xd8] sm:$0xff]   ;;  %v1676_v20 = vld [vmem:[#allocation2 + $0x50] sm:$0xff]  }
  0x13   :  { %v1670_v14 = vld [vmem:[#allocation2 + $0x20] sm:$0xff]   ;;  %v1674_v18 = vld [vmem:[#allocation2 + $0x18] sm:$0xff]   ;;  %v1677_v21 = vld [vmem:[#allocation2 + $0xd0] sm:$0xff]  }
  0x14   :  { %1490 = vmatpush3.bf16.msra.mxu0 %v1662_v6  ;;  %v1671_v15 = vld [vmem:[#allocation2 + $0xa0] sm:$0xff]   ;;  %v1675_v19 = vld [vmem:[#allocation2 + $0x98] sm:$0xff]   ;;  %v1678_v22 = vld [vmem:[#allocation2 + $0x10] sm:$0xff]  }
  0x15   :  { %1518 = vmatpush3.bf16.msra.mxu1 %v1663_v7  ;;  %1491 = vmatprep.subr.bf16.mxu0 %v1664_v8  ;;  %v1679_v23 = vld [vmem:[#allocation2 + $0x90] sm:$0xff]   ;;  %v1680_v24 = vld [vmem:[#allocation2 + $0x48] sm:$0xff]   ;;  %v1684_v28 = vld [vmem:[#allocation2 + $0x40] sm:$0xff]  }
  0x16   :  { %1519 = vmatprep.subr.bf16.mxu1 %v1665_v9  ;;  %v1681_v25 = vld [vmem:[#allocation2 + $0xc8] sm:$0xff]   ;;  %v1685_v29 = vld [vmem:[#allocation2 + $0xc0] sm:$0xff]   ;;  %v1688_v40 = vld [vmem:[#allocation2 + $0x178] sm:$0xff]  }
  0x17   :  { %v1682_v26 = vld [vmem:[#allocation2 + $0x8] sm:$0xff]   ;;  %v1686_v30 = vld [vmem:[#allocation2] sm:$0xff]   ;;  %v1689_v41 = vld [vmem:[#allocation2 + $0x1f8] sm:$0xff]  }
  0x18   :  { %1492 = vmatpush3.bf16.msra.mxu0 %v1666_v10  ;;  %v1683_v27 = vld [vmem:[#allocation2 + $0x88] sm:$0xff]   ;;  %v1687_v31 = vld [vmem:[#allocation2 + $0x80] sm:$0xff]   ;;  %v1690_v42 = vld [vmem:[#allocation2 + $0x138] sm:$0xff]  }
  0x19   :  { %1520 = vmatpush3.bf16.msra.mxu1 %v1667_v11  ;;  %1493 = vmatprep.subr.bf16.mxu0 %v1668_v12  ;;  %v44_v32 = vld [vmem:[%s2046_s0] sm:$0xff]  ;;  %v45_v34 = vld [vmem:[%s2046_s0 + $0x8] sm:$0xff]  ;;  %v1691_v43 = vld [vmem:[#allocation2 + $0x1b8] sm:$0xff]  }
  0x1a   :  { %1521 = vmatprep.subr.bf16.mxu1 %v1669_v13  ;;  %v48_v33 = vld [vmem:[%s2046_s0 + $0x20] sm:$0xff]  ;;  %v49_v37 = vld [vmem:[%s2046_s0 + $0x28] sm:$0xff]  ;;  %v1692_v44 = vld [vmem:[#allocation2 + $0x170] sm:$0xff]  }
  0x1b   :  { %v1374_v35 = vcombine.low %v44_v32, %v48_v33  ;;  %v1375_v36 = vcombine.high %v44_v32, %v48_v33  ;;  %v1376_v38 = vcombine.low %v45_v34, %v49_v37  ;;  %v1377_v39 = vcombine.high %v45_v34, %v49_v37  ;;  %v1693_v45 = vld [vmem:[#allocation2 + $0x1f0] sm:$0xff]   ;;  %v1696_v48 = vld [vmem:[#allocation2 + $0x168] sm:$0xff]   ;;  %v1700_v52 = vld [vmem:[#allocation2 + $0x160] sm:$0xff]  }
  0x1c   :  { %1494 = vmatpush3.bf16.msra.mxu0 %v1670_v14  ;;  %v1694_v46 = vld [vmem:[#allocation2 + $0x130] sm:$0xff]   ;;  %v1697_v49 = vld [vmem:[#allocation2 + $0x1e8] sm:$0xff]   ;;  %v1701_v53 = vld [vmem:[#allocation2 + $0x1e0] sm:$0xff]  }
  0x1d   :  { %1522 = vmatpush3.bf16.msra.mxu1 %v1671_v15  ;;  %1495 = vmatprep.subr.bf16.mxu0 %v1672_v16  ;;  %v1695_v47 = vld [vmem:[#allocation2 + $0x1b0] sm:$0xff]   ;;  %v1698_v50 = vld [vmem:[#allocation2 + $0x128] sm:$0xff]   ;;  %v1702_v54 = vld [vmem:[#allocation2 + $0x120] sm:$0xff]  }
  0x1e   :  { %1523 = vmatprep.subr.bf16.mxu1 %v1673_v17  ;;  %684 = vmatprep.mubr.bf16.mxu0 %v1375_v36  ;;  %v1699_v51 = vld [vmem:[#allocation2 + $0x1a8] sm:$0xff]   ;;  %v1703_v55 = vld [vmem:[#allocation2 + $0x1a0] sm:$0xff]   ;;  %v1704_v56 = vld [vmem:[#allocation2 + $0x158] sm:$0xff]  }
  0x1f   :  { %733 = vmatprep.mubr.bf16.mxu1 %v1377_v39  ;;  %v1705_v57 = vld [vmem:[#allocation2 + $0x1d8] sm:$0xff]   ;;  %v52_v58 = vld [vmem:[%s2046_s0 + $0x40] sm:$0xff]  ;;  %v53_v61 = vld [vmem:[%s2046_s0 + $0x48] sm:$0xff] }
  0x20   :  { %1496 = vmatpush3.bf16.msra.mxu0 %v1674_v18  ;;  %v56_v59 = vld [vmem:[%s2046_s0 + $0x60] sm:$0x33]  ;;  %v57_v62 = vld [vmem:[%s2046_s0 + $0x68] sm:$0x33]  ;;  %v1706_v1 = vld [vmem:[#allocation2 + $0x118] sm:$0xff]  }
  0x21   :  { %1524 = vmatpush3.bf16.msra.mxu1 %v1675_v19  ;;  %1497 = vmatprep.subr.bf16.mxu0 %v1676_v20  ;;  %v1383_v60 = vcombine.high %v52_v58, %v56_v59  ;;  %v1382_v63 = vcombine.low %v52_v58, %v56_v59  ;;  %v1385_v0 = vcombine.high %v53_v61, %v57_v62  ;;  %v1707_v3 = vld [vmem:[#allocation2 + $0x198] sm:$0xff]   ;;  %v1708_v4 = vld [vmem:[#allocation2 + $0x150] sm:$0xff]   ;;  %v1712_v8 = vld [vmem:[#allocation2 + $0x148] sm:$0xff]  }
  0x22   :  { %1525 = vmatprep.subr.bf16.mxu1 %v1677_v21  ;;  %v1384_v2 = vcombine.low %v53_v61, %v57_v62  ;;  %v1709_v5 = vld [vmem:[#allocation2 + $0x1d0] sm:$0xff]   ;;  %v1713_v9 = vld [vmem:[#allocation2 + $0x1c8] sm:$0xff]   ;;  %v1716_v12 = vld [vmem:[#allocation2 + $0x140] sm:$0xff]  }
  0x23   :  { %v1710_v6 = vld [vmem:[#allocation2 + $0x110] sm:$0xff]   ;;  %v1714_v10 = vld [vmem:[#allocation2 + $0x108] sm:$0xff]   ;;  %v1717_v13 = vld [vmem:[#allocation2 + $0x1c0] sm:$0xff]  }
  0x24   :  { %1498 = vmatpush3.bf16.msra.mxu0 %v1678_v22  ;;  %v1711_v7 = vld [vmem:[#allocation2 + $0x190] sm:$0xff]   ;;  %v1715_v11 = vld [vmem:[#allocation2 + $0x188] sm:$0xff]   ;;  %v1718_v14 = vld [vmem:[#allocation2 + $0x100] sm:$0xff]  }
  0x25   :  { %1526 = vmatpush3.bf16.msra.mxu1 %v1679_v23  ;;  %1499 = vmatprep.subr.bf16.mxu0 %v1680_v24  ;;  %v1719_v15 = vld [vmem:[#allocation2 + $0x180] sm:$0xff]   ;;  %v46_v16 = vld [vmem:[%s2046_s0 + $0x10] sm:$0xff]  ;;  %v47_v18 = vld [vmem:[%s2046_s0 + $0x18] sm:$0xff] }
  0x26   :  { %1527 = vmatprep.subr.bf16.mxu1 %v1681_v25  ;;  %v50_v17 = vld [vmem:[%s2046_s0 + $0x30] sm:$0xff]  ;;  %v51_v19 = vld [vmem:[%s2046_s0 + $0x38] sm:$0xff] }
  0x27   :  { %v1378_v20 = vcombine.low %v46_v16, %v50_v17  ;;  %v1379_v21 = vcombine.high %v46_v16, %v50_v17  ;;  %v1380_v22 = vcombine.low %v47_v18, %v51_v19  ;;  %v1381_v23 = vcombine.high %v47_v18, %v51_v19  ;;  %v54_v24 = vld [vmem:[%s2046_s0 + $0x50] sm:$0xff] }
  0x28   :  { %1500 = vmatpush3.bf16.msra.mxu0 %v1682_v26  ;;  %v58_v25 = vld [vmem:[%s2046_s0 + $0x70] sm:$0x33]  ;;  %v55_v26 = vld [vmem:[%s2046_s0 + $0x58] sm:$0xff] }
  0x29   :  { %1528 = vmatpush3.bf16.msra.mxu1 %v1683_v27  ;;  %1501 = vmatprep.subr.bf16.mxu0 %v1684_v28  ;;  %v1387_v27 = vcombine.high %v54_v24, %v58_v25  ;;  %v59_v28 = vld [vmem:[%s2046_s0 + $0x78] sm:$0x33] }
  0x2a   :  { %1529 = vmatprep.subr.bf16.mxu1 %v1685_v29  ;;  %v1389_v29 = vcombine.high %v55_v26, %v59_v28 }
  0x2c   :  { %1502 = vmatpush3.bf16.msra.mxu0 %v1686_v30  ;;  %v1386_v30 = vcombine.low %v54_v24, %v58_v25 }
  0x2d   :  { %1530 = vmatpush3.bf16.msra.mxu1 %v1687_v31  ;;  %1543 = vmatprep.subr.bf16.mxu0 %v1688_v40  ;;  %v1388_v31 = vcombine.low %v55_v26, %v59_v28  ;;  %v850_v26 = vld [vmem:[%s2048_s2 + $0x10] sm:$0xff] }
  0x2e   :  { %1571 = vmatprep.subr.bf16.mxu1 %v1689_v41 }
  0x2f   :  { %685 = vmatmul.mubr.bf16.vlgmr.msra.gmra.mxu0 %v1374_v35 }
  0x30   :  { %734 = vmatmul.mubr.bf16.vlgmr.msra.gmra.mxu1 %v1376_v38  ;;  %1544 = vmatpush3.bf16.msra.mxu0 %v1690_v42 }
  0x31   :  { %1572 = vmatpush3.bf16.msra.mxu1 %v1691_v43  ;;  %1545 = vmatprep.subr.bf16.mxu0 %v1692_v44 }
  0x32   :  { %1573 = vmatprep.subr.bf16.mxu1 %v1693_v45  ;;  %692 = vmatprep.mubr.bf16.mxu0 %v1383_v60 }
  0x33   :  { %741 = vmatprep.mubr.bf16.mxu1 %v1385_v0 }
  0x34   :  { %1546 = vmatpush3.bf16.msra.mxu0 %v1694_v46 }
  0x35   :  { %1574 = vmatpush3.bf16.msra.mxu1 %v1695_v47  ;;  %1547 = vmatprep.subr.bf16.mxu0 %v1696_v48 }
  0x36   :  { %1575 = vmatprep.subr.bf16.mxu1 %v1697_v49 }
  0x37   :  { %693 = vmatmul.mubr.bf16.gmra.mxu0 %v1382_v63 }
  0x38   :  { %1548 = vmatpush3.bf16.msra.mxu0 %v1698_v50  ;;  %742 = vmatmul.mubr.bf16.gmra.mxu1 %v1384_v2 }
  0x39   :  { %1576 = vmatpush3.bf16.msra.mxu1 %v1699_v51  ;;  %1549 = vmatprep.subr.bf16.mxu0 %v1700_v52 }
  0x3a   :  { %1577 = vmatprep.subr.bf16.mxu1 %v1701_v53  ;;  %782 = vmatprep.mubr.bf16.mxu0 %v1379_v21 }
  0x3b   :  { %831 = vmatprep.mubr.bf16.mxu1 %v1381_v23 }
  0x3c   :  { %1550 = vmatpush3.bf16.msra.mxu0 %v1702_v54 }
  0x3d   :  { %1578 = vmatpush3.bf16.msra.mxu1 %v1703_v55  ;;  %1551 = vmatprep.subr.bf16.mxu0 %v1704_v56 }
  0x3e   :  { %1579 = vmatprep.subr.bf16.mxu1 %v1705_v57 }
  0x40   :  { %1552 = vmatpush3.bf16.msra.mxu0 %v1706_v1 }
  0x41   :  { %1580 = vmatpush3.bf16.msra.mxu1 %v1707_v3  ;;  %1553 = vmatprep.subr.bf16.mxu0 %v1708_v4 }
  0x42   :  { %1581 = vmatprep.subr.bf16.mxu1 %v1709_v5 }
  0x44   :  { %1554 = vmatpush3.bf16.msra.mxu0 %v1710_v6 }
  0x45   :  { %1582 = vmatpush3.bf16.msra.mxu1 %v1711_v7  ;;  %1555 = vmatprep.subr.bf16.mxu0 %v1712_v8 }
  0x46   :  { %1583 = vmatprep.subr.bf16.mxu1 %v1713_v9 }
  0x48   :  { %1556 = vmatpush3.bf16.msra.mxu0 %v1714_v10 }
  0x49   :  { %1584 = vmatpush3.bf16.msra.mxu1 %v1715_v11  ;;  %1557 = vmatprep.subr.bf16.mxu0 %v1716_v12 }
  0x4a   :  { %1585 = vmatprep.subr.bf16.mxu1 %v1717_v13 }
  0x4c   :  { %1558 = vmatpush3.bf16.msra.mxu0 %v1718_v14 }
  0x4d   :  { %1586 = vmatpush3.bf16.msra.mxu1 %v1719_v15 }
  0x4f   :  { %783 = vmatmul.mubr.bf16.vlgmr.msra.gmra.mxu0 %v1378_v20 }
  0x50   :  { %832 = vmatmul.mubr.bf16.vlgmr.msra.gmra.mxu1 %v1380_v22  ;;  %790 = vmatprep.mubr.bf16.mxu0 %v1387_v27  ;;  %v1762_v22 = vmov 0.0  }
  0x51   :  { %839 = vmatprep.mubr.bf16.mxu1 %v1389_v29  ;;  %1613 = vmatprep.subr.bf16.mxu0 %v1762_v22  ;;  %v851_v29 = vld [vmem:[%s2048_s2 + $0x18] sm:$0xf] }
  0x52   :  { %1619 = vmatprep.subr.bf16.mxu1 %v1762_v22 }
  0x57   :  { %791 = vmatmul.mubr.bf16.gmra.mxu0 %v1386_v30 }
  0x58   :  { %840 = vmatmul.mubr.bf16.gmra.mxu1 %v1388_v31  ;;  %1615 = vmatprep.mubr.msk.bf16.mxu0 %vm1763_vm0, %v1762_v22 }
  0x59   :  { %1623 = vmatprep.mubr.msk.bf16.mxu1 %vm1763_vm0, %v1762_v22 }
  0xef   :  { %v1503_v32 = vpop.f32.mrf.mxu0 }
  0xf0   :  { %v1531_v33 = vpop.f32.mrf.mxu1 }
  0xf1   :  { %v1504_v34 = vpop.f32.mrf.mxu0 }
  0xf2   :  { %v1505_v35 = vadd.f32 %v1504_v34, %v1503_v32  ;;  %v1532_v36 = vpop.f32.mrf.mxu1  ;;  %v858_v32 = vld [vmem:[%s2049_s3 + $0x10] sm:$0xff] }
  0xf3   :  { %v1533_v37 = vadd.f32 %v1532_v36, %v1531_v33  ;;  %v1506_v38 = vpop.f32.mrf.mxu0  ;;  %v859_v33 = vld [vmem:[%s2049_s3 + $0x18] sm:$0xf] }
  0xf4   :  { %v1534_v39 = vpop.f32.mrf.mxu1 }
  0xf5   :  { %v736_v40 = vadd.f32 %v1533_v37, %v1505_v35  ;;  %v1507_v41 = vpop.f32.mrf.mxu0 }
  0xf6   :  { %v1508_v42 = vadd.f32 %v1507_v41, %v1506_v38  ;;  %v1535_v43 = vpop.f32.mrf.mxu1  ;;  %v1721_v41 = vld [vmem:[%s2051_s5 + $0x8] ss:$0 sps:$4 sm:$0xff]  }
  0xf7   :  { %v1536_v44 = vadd.f32 %v1535_v43, %v1534_v39  ;;  %v1509_v46 = vpop.f32.mrf.mxu0  ;;  %v1722_v43 = vld [vmem:[%s2051_s5] sm:$0xff]  }
  0xf8   :  { %v1537_v47 = vpop.f32.mrf.mxu1 }
  0xf9   :  { %v739_v45 = vadd.f32 %v1536_v44, %v1508_v42  ;;  %v1510_v48 = vpop.f32.mrf.mxu0  ;;  %v943_v42 = vsel %vm941_vm3, %v1721_v41, 0 }
  0xfa   :  { %v1538_v49 = vpop.f32.mrf.mxu1  ;;  %v1511_v63 = vadd.f32 %v1510_v48, %v1509_v46  ;;  %1620 = vmatpush3.bf16.msra.mxu1 %v943_v42 }
  0xfb   :  { %v1512_v50 = vpop.f32.mrf.mxu0  ;;  %v1539_v0 = vadd.f32 %v1538_v49, %v1537_v47  ;;  %1621 = vmatprep.subr.bf16.mxu1 %v1762_v22  ;;  %v1723_v49 = vld [vmem:[%s2052_s6] sm:$0xff]  }
  0xfc   :  { %v1540_v51 = vpop.f32.mrf.mxu1 }
  0xfd   :  { %v1513_v52 = vpop.f32.mrf.mxu0  ;;  %v744_v9 = vadd.f32 %v1539_v0, %v1511_v63 }
  0xfe   :  { %v1541_v53 = vpop.f32.mrf.mxu1  ;;  %v1514_v12 = vadd.f32 %v1513_v52, %v1512_v50  ;;  %1622 = vmatpush3.bf16.msra.mxu1 %v1722_v43  ;;  %v848_v50 = vld [vmem:[%s2048_s2] sm:$0xff] }
  0xff   :  { %v1542_v13 = vadd.f32 %v1541_v53, %v1540_v51  ;;  %v849_v51 = vld [vmem:[%s2048_s2 + $0x8] sm:$0xff] }
 0x101   :  { %v747_v23 = vadd.f32 %v1542_v13, %v1514_v12  ;;  %v1765_v12 = vmov 0  }
 0x10f   :  { %v1559_v54 = vpop.f32.mrf.mxu0 }
 0x110   :  { %v1587_v55 = vpop.f32.mrf.mxu1 }
 0x111   :  { %v1560_v56 = vpop.f32.mrf.mxu0 }
 0x112   :  { %v1588_v57 = vpop.f32.mrf.mxu1  ;;  %v1561_v58 = vadd.f32 %v1560_v56, %v1559_v54  ;;  %v856_v54 = vld [vmem:[%s2049_s3] sm:$0xff]  ;;  %v857_v56 = vld [vmem:[%s2049_s3 + $0x8] sm:$0xff] }
 0x113   :  { %v1589_v59 = vadd.f32 %v1588_v57, %v1587_v55  ;;  %v1562_v60 = vpop.f32.mrf.mxu0 }
 0x114   :  { %v1590_v61 = vpop.f32.mrf.mxu1  ;;  %v785_v62 = vadd.f32 %v1561_v58, %v736_v40  ;;  %v1720_v40 = vld [vmem:[%s2050_s4] sm:$0xff]  }
 0x115   :  { %v1563_v1 = vpop.f32.mrf.mxu0 }
 0x116   :  { %v1591_v2 = vpop.f32.mrf.mxu1  ;;  %v1862_v3 = vadd.f32 %v1589_v59, %v785_v62  ;;  %v1564_v4 = vadd.f32 %v1563_v1, %v1562_v60  ;;  %v1724_v1 = vld [vmem:[%s2052_s6 + $0x8] sm:$0xff]  }
 0x117   :  { %v1592_v5 = vadd.f32 %v1591_v2, %v1590_v61  ;;  %v1565_v6 = vpop.f32.mrf.mxu0  ;;  %v1725_v2 = vld [vmem:[%s2052_s6 + $0x10] sm:$0xff]  }
 0x118   :  { %v1593_v7 = vpop.f32.mrf.mxu1  ;;  %v788_v8 = vadd.f32 %v1564_v4, %v739_v45  ;;  %v852_v52 = vmul.f32 %v848_v50, %v1862_v3  ;;  %v1726_v3 = vld [vmem:[%s2052_s6 + $0x18] sm:$0xff]   ;;  %v1727_v4 = vld [vmem:[%s2052_s6 + $0x20] sm:$0xff]  }
 0x119   :  { %v1566_v10 = vpop.f32.mrf.mxu0 }
 0x11a   :  { %v1594_v11 = vpop.f32.mrf.mxu1  ;;  %v837_v14 = vadd.f32 %v1592_v5, %v788_v8  ;;  %v1567_v15 = vadd.f32 %v1566_v10, %v1565_v6  ;;  %v860_v58 = vadd.f32 %v856_v54, %v852_v52  ;;  %v1728_v5 = vld [vmem:[%s2052_s6 + $0x28] sm:$0xff]   ;;  %v1729_v6 = vld [vmem:[%s2052_s6 + $0x30] sm:$0xff]  }
 0x11b   :  { %v1568_v16 = vpop.f32.mrf.mxu0  ;;  %v1595_v19 = vadd.f32 %v1594_v11, %v1593_v7  ;;  %v1730_v7 = vld [vmem:[%s2052_s6 + $0x38] sm:$0xff]   ;;  %v1736_v10 = vld [vmem:[%s2053_s7 + $0x4] ss:$8 sps:$4 sm:$0xff]   ;;  %v1734_v11 = vld [vmem:[%s2053_s7] ss:$8 sps:$4 sm:$0xff]  }
 0x11c   :  { %v1596_v17 = vpop.f32.mrf.mxu1  ;;  %v793_v18 = vadd.f32 %v1567_v15, %v744_v9  ;;  %v853_v53 = vmul.f32 %v849_v51, %v837_v14  ;;  %v1731_v8 = vld [vmem:[%s2053_s7 + $0x10] ss:$8 sps:$4 sm:$0xff]   ;;  %v1733_v9 = vld [vmem:[%s2053_s7 + $0x14] ss:$8 sps:$4 sm:$0xff]  }
 0x11d   :  { %v1569_v20 = vpop.f32.mrf.mxu0  ;;  %1645 = vmatprep.subr.bf16.mxu1 %v1733_v9 }
 0x11e   :  { %v1597_v21 = vpop.f32.mrf.mxu1  ;;  %v842_v24 = vadd.f32 %v1595_v19, %v793_v18  ;;  %v1570_v25 = vadd.f32 %v1569_v20, %v1568_v16  ;;  %v861_v59 = vadd.f32 %v857_v56, %v853_v53 }
 0x11f   :  { %v1598_v28 = vadd.f32 %v1597_v21, %v1596_v17 }
 0x120   :  { %v796_v27 = vadd.f32 %v1570_v25, %v747_v23  ;;  %v854_v30 = vmul.f32 %v850_v26, %v842_v24 }
 0x122   :  { %v845_v31 = vadd.f32 %v1598_v28, %v796_v27  ;;  %v862_v35 = vadd.f32 %v858_v32, %v854_v30 }
 0x124   :  { %v855_v34 = vmul.f32 %v851_v29, %v845_v31 }
 0x126   :  { %v863_v36 = vadd.f32 %v859_v33, %v855_v34 }
 0x128   :  { %v864_v37 = vpack.c.bf16 %v863_v36, %v862_v35 }
 0x12a   :  { %873 = vrot.lane.b32.xlu0 %v864_v37, %s1764_s27 }
 0x19c   :  { %v874_v38 = vpop.permute.xlu0 %873 }
 0x19d   :  { %v881_v39 = vsel %vm879_vm1, %v874_v38, 0 }
 0x19e   :  { %1614 = vmatpush3.bf16.msra.mxu0 %v881_v39 }
 0x1a1   :  { %1616 = vmatmul.mubr.msk.bf16.vlgmr.msra.gmra.mxu0 %vm875_vm2, %v1720_v40 }
 0x1a2   :  { %1629 = vmatprep.mubr.msk.bf16.mxu0 %vm1045_vm5, %v1723_v49 }
 0x261   :  { %v917_v44 = vpop.f32.mrf.mxu0 }
 0x263   :  { %v1617_v45 = vpop.f32.mrf.mxu0 }
 0x265   :  { %v920_v46 = vpop.f32.mrf.mxu0 }
 0x266   :  { %v924_v47 = vpack.c.bf16 %v920_v46, %v917_v44 }
 0x267   :  { %v1618_v48 = vpop.f32.mrf.mxu0 }
 0x268   :  { %1624 = vmatmul.mubr.msk.bf16.vlgmr.msra.gmra.mxu1 %vm937_vm4, %v924_v47 }
 0x269   :  { %1647 = vmatpush1.bf16.msra.mxu1 %v1731_v8  ;;  %1276 = vmatprep.mubr.bf16.mxu1 %v1765_v12 }
 0x26a   :  { %1646 = vmatprep.subr.bf16.mxu1 %v1736_v10 }
 0x26d   :  { %1648 = vmatpush1.bf16.msra.mxu1 %v1734_v11 }
 0x328   :  { %v979_v55 = vpop.f32.mrf.mxu1 }
 0x329   :  { %v986_v61 = vadd.f32 %v979_v55, %v860_v58 }
 0x32a   :  { %v1625_v57 = vpop.f32.mrf.mxu1 }
 0x32c   :  { %v982_v60 = vpop.f32.mrf.mxu1 }
 0x32d   :  { %v987_v62 = vadd.f32 %v982_v60, %v861_v59 }
 0x32e   :  { %v1626_v63 = vpop.f32.mrf.mxu1 }
 0x32f   :  { %v988_v0 = vpack.c.bf16 %v987_v62, %v986_v61 }
 0x331   :  { %1627 = vmatprep.subr.bf16.mxu0 %v988_v0 }
 0x332   :  { %1628 = vmatpush3.bf16.msra.mxu0 %v988_v0 }
 0x333   :  { %1236 = vmatprep.subr.bf16.mxu0 %v1733_v9 }
 0x335   :  { %1630 = vmatmul.mubr.msk.bf16.vlgmr.msra.gmra.mxu0 %vm1045_vm5, %v1724_v1 }
 0x336   :  { %1633 = vmatprep.mubr.msk.bf16.mxu0 %vm1045_vm5, %v1725_v2  ;;  %1237 = vmatpush1.bf16.msra.mxu0 %v1731_v8 }
 0x337   :  { %1238 = vmatprep.subr.bf16.mxu0 %v1736_v10 }
 0x33a   :  { %1239 = vmatpush1.bf16.msra.mxu0 %v1734_v11 }
 0x33d   :  { %1634 = vmatmul.mubr.msk.bf16.gmra.mxu0 %vm1045_vm5, %v1726_v3 }
 0x33e   :  { %1637 = vmatprep.mubr.msk.bf16.mxu0 %vm1045_vm5, %v1727_v4 }
 0x345   :  { %1638 = vmatmul.mubr.msk.bf16.gmra.mxu0 %vm1045_vm5, %v1728_v5 }
 0x346   :  { %1641 = vmatprep.mubr.msk.bf16.mxu0 %vm1045_vm5, %v1729_v6 }
 0x34d   :  { %1642 = vmatmul.mubr.msk.bf16.gmra.mxu0 %vm1045_vm5, %v1730_v7 }
 0x34e   :  { %1256 = vmatprep.mubr.bf16.mxu0 %v1765_v12 }
 0x3f5   :  { %v1631_v13 = vpop.f32.mrf.mxu0 }
 0x3f7   :  { %v1104_v14 = vpop.f32.mrf.mxu0 }
 0x3f9   :  { %v1632_v15 = vpop.f32.mrf.mxu0 }
 0x3fa   :  { %v1168_v22 = vpack.c.bf16 %v1632_v15, %v1631_v13 }
 0x3fb   :  { %v1107_v16 = vpop.f32.mrf.mxu0 }
 0x3fc   :  { %v1167_v17 = vpack.c.bf16 %v1107_v16, %v1104_v14 }
 0x3fd   :  { %v1635_v18 = vpop.f32.mrf.mxu0 }
 0x3fe   :  { %1479 = vmatmul.mubr.msk.bf16.vlgmr.msra.gmra.mxu0 %vm1199_vm6, %v1167_v17 }
 0x3ff   :  { %v1120_v19 = vpop.f32.mrf.mxu0  ;;  %1266 = vmatprep.mubr.bf16.mxu0 %v1765_v12 }
 0x401   :  { %v1636_v20 = vpop.f32.mrf.mxu0 }
 0x402   :  { %v1170_v26 = vpack.c.bf16 %v1636_v20, %v1635_v18 }
 0x403   :  { %v1123_v21 = vpop.f32.mrf.mxu0 }
 0x404   :  { %v1169_v23 = vpack.c.bf16 %v1123_v21, %v1120_v19 }
 0x405   :  { %v1639_v24 = vpop.f32.mrf.mxu0 }
 0x406   :  { %1480 = vmatmul.mubr.msk.bf16.gmra.mxu0 %vm1199_vm6, %v1168_v22  ;;  %1481 = vmatmul.mubr.msk.bf16.vlgmr.msra.gmra.mxu1 %vm1199_vm6, %v1169_v23 }
 0x407   :  { %1286 = vmatprep.mubr.bf16.mxu1 %v1765_v12  ;;  %v1136_v25 = vpop.f32.mrf.mxu0 }
 0x409   :  { %v1640_v27 = vpop.f32.mrf.mxu0 }
 0x40a   :  { %v1172_v32 = vpack.c.bf16 %v1640_v27, %v1639_v24 }
 0x40b   :  { %v1139_v28 = vpop.f32.mrf.mxu0 }
 0x40c   :  { %v1171_v29 = vpack.c.bf16 %v1139_v28, %v1136_v25 }
 0x40d   :  { %v1643_v30 = vpop.f32.mrf.mxu0 }
 0x40e   :  { %1482 = vmatmul.mubr.msk.bf16.gmra.mxu1 %vm1199_vm6, %v1170_v26 }
 0x40f   :  { %1296 = vmatprep.mubr.bf16.mxu1 %v1765_v12  ;;  %v1152_v31 = vpop.f32.mrf.mxu0 }
 0x411   :  { %v1644_v33 = vpop.f32.mrf.mxu0 }
 0x412   :  { %v1174_v36 = vpack.c.bf16 %v1644_v33, %v1643_v30 }
 0x413   :  { %v1155_v34 = vpop.f32.mrf.mxu0 }
 0x414   :  { %v1173_v35 = vpack.c.bf16 %v1155_v34, %v1152_v31 }
 0x416   :  { %1483 = vmatmul.mubr.msk.bf16.gmra.mxu1 %vm1199_vm6, %v1171_v29 }
 0x417   :  { %1306 = vmatprep.mubr.bf16.mxu1 %v1765_v12 }
 0x41e   :  { %1484 = vmatmul.mubr.msk.bf16.gmra.mxu1 %vm1199_vm6, %v1172_v32 }
 0x41f   :  { %1316 = vmatprep.mubr.bf16.mxu1 %v1765_v12 }
 0x426   :  { %1485 = vmatmul.mubr.msk.bf16.gmra.mxu1 %vm1199_vm6, %v1173_v35 }
 0x427   :  { %1326 = vmatprep.mubr.bf16.mxu1 %v1765_v12 }
 0x42e   :  { %1486 = vmatmul.mubr.msk.bf16.gmra.mxu1 %vm1199_vm6, %v1174_v36 }
 0x4be   :  { %v1258_v37 = vpop.f32.mrf.mxu0 }
 0x4bf   :  { %1337 = vst [vmem:[%s2054_s8] sm:$0xff] %v1258_v37 }
 0x4c0   :  { %v1260_v38 = vpop.f32.mrf.mxu0 }
 0x4c1   :  { %1338 = vst [vmem:[%s2054_s8 + $0x8] sm:$0xff] %v1260_v38 }
 0x4c2   :  { %v1262_v39 = vpop.f32.mrf.mxu0 }
 0x4c3   :  { %1339 = vst [vmem:[%s2054_s8 + $0x10] sm:$0xff] %v1262_v39 }
 0x4c4   :  { %v1264_v40 = vpop.f32.mrf.mxu0 }
 0x4c5   :  { %1340 = vst [vmem:[%s2054_s8 + $0x18] sm:$0xff] %v1264_v40 }
 0x4c6   :  { %v1268_v41 = vpop.f32.mrf.mxu0  ;;  %v1278_v42 = vpop.f32.mrf.mxu1 }
 0x4c7   :  { %1341 = vst [vmem:[%s2054_s8 + $0x20] sm:$0xff] %v1268_v41  ;;  %1345 = vst [vmem:[%s2054_s8 + $0x40] sm:$0xff] %v1278_v42 }
 0x4c8   :  { %v1270_v43 = vpop.f32.mrf.mxu0  ;;  %v1280_v44 = vpop.f32.mrf.mxu1 }
 0x4c9   :  { %1342 = vst [vmem:[%s2054_s8 + $0x28] sm:$0xff] %v1270_v43  ;;  %1346 = vst [vmem:[%s2054_s8 + $0x48] sm:$0xff] %v1280_v44 }
 0x4ca   :  { %v1272_v45 = vpop.f32.mrf.mxu0  ;;  %v1282_v46 = vpop.f32.mrf.mxu1 }
 0x4cb   :  { %1343 = vst [vmem:[%s2054_s8 + $0x30] sm:$0xff] %v1272_v45  ;;  %1347 = vst [vmem:[%s2054_s8 + $0x50] sm:$0xff] %v1282_v46 }
 0x4cc   :  { %v1274_v47 = vpop.f32.mrf.mxu0  ;;  %v1284_v48 = vpop.f32.mrf.mxu1 }
 0x4cd   :  { %1344 = vst [vmem:[%s2054_s8 + $0x38] sm:$0xff] %v1274_v47  ;;  %1348 = vst [vmem:[%s2054_s8 + $0x58] sm:$0xff] %v1284_v48 }
 0x4ce   :  { %v1288_v49 = vpop.f32.mrf.mxu1 }
 0x4cf   :  { %1349 = vst [vmem:[%s2054_s8 + $0x60] sm:$0xff] %v1288_v49 }
 0x4d0   :  { %v1290_v50 = vpop.f32.mrf.mxu1 }
 0x4d1   :  { %1350 = vst [vmem:[%s2054_s8 + $0x68] sm:$0xff] %v1290_v50 }
 0x4d2   :  { %v1292_v51 = vpop.f32.mrf.mxu1 }
 0x4d3   :  { %1351 = vst [vmem:[%s2054_s8 + $0x70] sm:$0xff] %v1292_v51 }
 0x4d4   :  { %v1294_v52 = vpop.f32.mrf.mxu1 }
 0x4d5   :  { %1352 = vst [vmem:[%s2054_s8 + $0x78] sm:$0xff] %v1294_v52 }
 0x4d6   :  { %v1298_v53 = vpop.f32.mrf.mxu1 }
 0x4d7   :  { %1353 = vst [vmem:[%s2054_s8 + $0x80] sm:$0xff] %v1298_v53 }
 0x4d8   :  { %v1300_v54 = vpop.f32.mrf.mxu1 }
 0x4d9   :  { %1354 = vst [vmem:[%s2054_s8 + $0x88] sm:$0xff] %v1300_v54 }
 0x4da   :  { %v1302_v55 = vpop.f32.mrf.mxu1 }
 0x4db   :  { %1355 = vst [vmem:[%s2054_s8 + $0x90] sm:$0xff] %v1302_v55 }
 0x4dc   :  { %v1304_v56 = vpop.f32.mrf.mxu1 }
 0x4dd   :  { %1356 = vst [vmem:[%s2054_s8 + $0x98] sm:$0xff] %v1304_v56 }
 0x4de   :  { %v1308_v57 = vpop.f32.mrf.mxu1 }
 0x4df   :  { %1357 = vst [vmem:[%s2054_s8 + $0xa0] sm:$0xff] %v1308_v57 }
 0x4e0   :  { %v1310_v58 = vpop.f32.mrf.mxu1 }
 0x4e1   :  { %1358 = vst [vmem:[%s2054_s8 + $0xa8] sm:$0xff] %v1310_v58 }
 0x4e2   :  { %v1312_v59 = vpop.f32.mrf.mxu1 }
 0x4e3   :  { %1359 = vst [vmem:[%s2054_s8 + $0xb0] sm:$0xff] %v1312_v59 }
 0x4e4   :  { %v1314_v60 = vpop.f32.mrf.mxu1 }
 0x4e5   :  { %1360 = vst [vmem:[%s2054_s8 + $0xb8] sm:$0xff] %v1314_v60 }
 0x4e6   :  { %v1318_v61 = vpop.f32.mrf.mxu1 }
 0x4e7   :  { %1361 = vst [vmem:[%s2054_s8 + $0xc0] sm:$0xff] %v1318_v61 }
 0x4e8   :  { %v1320_v62 = vpop.f32.mrf.mxu1 }
 0x4e9   :  { %1362 = vst [vmem:[%s2054_s8 + $0xc8] sm:$0xff] %v1320_v62 }
 0x4ea   :  { %v1322_v63 = vpop.f32.mrf.mxu1 }
 0x4eb   :  { %1363 = vst [vmem:[%s2054_s8 + $0xd0] sm:$0xff] %v1322_v63 }
 0x4ec   :  { %v1324_v0 = vpop.f32.mrf.mxu1 }
 0x4ed   :  { %1364 = vst [vmem:[%s2054_s8 + $0xd8] sm:$0xff] %v1324_v0 }
 0x4ee   :  { %v1328_v1 = vpop.f32.mrf.mxu1 }
 0x4ef   :  { %1365 = vst [vmem:[%s2054_s8 + $0xe0] sm:$0xff] %v1328_v1 }
 0x4f0   :  { %v1330_v2 = vpop.f32.mrf.mxu1 }
 0x4f1   :  { %1366 = vst [vmem:[%s2054_s8 + $0xe8] sm:$0xff] %v1330_v2 }
 0x4f2   :  { %v1332_v3 = vpop.f32.mrf.mxu1 }
 0x4f3   :  { %1367 = vst [vmem:[%s2054_s8 + $0xf0] sm:$0xff] %v1332_v3 }
 0x4f4   :  { %v1334_v4 = vpop.f32.mrf.mxu1 }
 0x4f5   :  { %1368 = vst [vmem:[%s2054_s8 + $0xf8] sm:$0xff] %v1334_v4 }
 0x4f6   :  { %1373 = vsyncpa [#allocation3], 1 }

</bundles_post_ra>
